<compile_context>
chip_gen: v7x
topology: tpu7x:2x2x1
jax: 0.10.0
libtpu: 0.0.40
codegen_flags: <defaults>
</compile_context>

<pallas_src>
import functools

import jax
import jax.numpy as jnp
from jax.experimental import pallas as pl
from jax.experimental.pallas import tpu as pltpu


def critic_kernel(x_ref, w1_ref, w2_ref, b12_ref, w3_ref, b3_ref, out_ref, *,
                  state_size, h1, h2):
    x = x_ref[...]                       # (TB, S+A)  bf16   ([obs_flat | action])
    obs = x[:, :state_size]              # (TB, S)    bf16
    act = x[:, state_size:]              # (TB, A)    bf16
    w2 = w2_ref[...]                     # (H1+A, H2) bf16   ([w2h ; w2a])
    b12 = b12_ref[...]                   # (2, Hmax)  f32    ([b1 ; b2], lane-padded)

    # observation_net: Linear + ReLU  (bf16 MXU pass, f32 accumulate)
    h = jnp.dot(obs, w1_ref[...], preferred_element_type=jnp.float32)
    h = jnp.maximum(h + b12[0:1, :h1], 0.0)

    # feature_net: Linear(concat([h, action])) + ReLU, as split matmuls
    f = (jnp.dot(h.astype(jnp.bfloat16), w2[:h1, :],
                 preferred_element_type=jnp.float32)
         + jnp.dot(act, w2[h1:, :], preferred_element_type=jnp.float32)
         + b12[1:2, :h2])
    f = jnp.maximum(f, 0.0)

    # value_net (n_atoms == 1): VPU multiply + XLU lane reduction instead of an
    # N=1 MXU matmul; w3 arrives as a (1, H2) row vector, b3 as an SMEM scalar.
    out_ref[...] = (jnp.sum(f * w3_ref[...], axis=-1, keepdims=True)
                    + b3_ref[0, 0])


def _pick_tb(b):
    """Batch tile: prefer >=2 blocks of multiple-of-8 rows (lets v7x use both TCs)."""
    for tb in (256, 128, 64, 32, 16, 8):
        if b % tb == 0 and b // tb >= 2:
            return tb
    return b  # small batch: single block covering the full batch


@jax.jit
def critic_forward(observation, action, packed):
    """observation: (B, C, H, W) f32, action: (B, A) f32, packed: pack_params(...)."""
    w1, w2, b12, w3row, b3 = packed
    b = observation.shape[0]
    obs_flat = observation.reshape(b, -1)          # matches observation.view(B, -1)
    state_size = obs_flat.shape[1]
    h1, h2 = w1.shape[1], w2.shape[1]

    # Single packed activation operand, bf16 on the MXU path.
    x = jnp.concatenate([obs_flat, action], axis=1).astype(jnp.bfloat16)

    tb = _pick_tb(b)
    grid = (b // tb,)
    kernel = functools.partial(critic_kernel, state_size=state_size, h1=h1, h2=h2)

    return pl.pallas_call(
        kernel,
        out_shape=jax.ShapeDtypeStruct((b, 1), jnp.float32),
        grid=grid,
        in_specs=[
            pl.BlockSpec((tb, x.shape[1]), lambda i: (i, 0)),     # activations (tiled on B)
            pl.BlockSpec(w1.shape, lambda i: (0, 0)),             # w1  (S, H1)      bf16
            pl.BlockSpec(w2.shape, lambda i: (0, 0)),             # w2  (H1+A, H2)   bf16
            pl.BlockSpec(b12.shape, lambda i: (0, 0)),            # [b1; b2]         f32
            pl.BlockSpec(w3row.shape, lambda i: (0, 0)),          # w3 row (1, H2)   f32
            pl.BlockSpec(memory_space=pltpu.MemorySpace.SMEM),    # b3 (1, 1) scalar
        ],
        out_specs=pl.BlockSpec((tb, 1), lambda i: (i, 0)),
        compiler_params=pltpu.CompilerParams(dimension_semantics=("parallel",)),
    )(x, w1, w2, b12, w3row, b3)


def init_params(key, state_size, action_size, hiddens, n_atoms):
    """f32 'module' params in PyTorch semantics: (w1, b1, w2, b2, w3, b3)."""
    h1, h2 = hiddens
    ks = jax.random.split(key, 4)

    def kaiming(k, fan_in, shape):
        return jax.random.normal(k, shape, jnp.float32) * jnp.sqrt(2.0 / fan_in)

    w1 = kaiming(ks[0], state_size, (state_size, h1))
    b1 = jnp.zeros((h1,), jnp.float32)
    w2 = kaiming(ks[1], h1 + action_size, (h1 + action_size, h2))   # [w2h ; w2a]
    b2 = jnp.zeros((h2,), jnp.float32)
    w3 = jax.random.uniform(ks[2], (h2, n_atoms), jnp.float32, -3e-3, 3e-3)
    b3 = jax.random.uniform(ks[3], (n_atoms,), jnp.float32, -3e-3, 3e-3)
    return (w1, b1, w2, b2, w3, b3)


def pack_params(params):
    """Pack module params into the kernel operand layout (bf16 weights, stacked biases)."""
    w1, b1, w2, b2, w3, b3 = params
    h1, h2 = w1.shape[1], w2.shape[1]
    n_atoms = w3.shape[1]
    assert n_atoms == 1, "kernel specializes value_net to n_atoms == 1 (module default)"
    hmax = max(h1, h2)
    b12 = jnp.zeros((2, hmax), jnp.float32)
    b12 = b12.at[0, :h1].set(b1).at[1, :h2].set(b2)
    return (w1.astype(jnp.bfloat16),                    # (S, H1)
            w2.astype(jnp.bfloat16),                    # (H1+A, H2)
            b12,                                        # (2, Hmax)
            w3.T.astype(jnp.float32),                   # (1, H2) row vector
            b3.reshape(1, 1).astype(jnp.float32))       # (1, 1) SMEM scalar


def critic_reference(observation, action, params):
    """Pure-JAX reference mirroring the PyTorch forward, with the same bf16
    weight/activation quantization the kernel applies (f32 accumulation)."""
    w1, b1, w2, b2, w3, b3 = params
    x = observation.reshape(observation.shape[0], -1).astype(jnp.bfloat16)
    a = action.astype(jnp.bfloat16)
    h = jax.nn.relu(jnp.dot(x, w1.astype(jnp.bfloat16),
                            preferred_element_type=jnp.float32) + b1)
    cat = jnp.concatenate([h.astype(jnp.bfloat16), a], axis=1)
    f = jax.nn.relu(jnp.dot(cat, w2.astype(jnp.bfloat16),
                            preferred_element_type=jnp.float32) + b2)
    return jnp.dot(f, w3) + b3


if __name__ == "__main__":
    # Config consistent with the module's constructor:
    #   state_shape=(4, 4, 4) -> state_size=64, action_size=16,
    #   hiddens=[128, 128], concat_at=1, n_atoms=1
    batch = 8
    state_shape = (4, 4, 4)
    state_size = 4 * 4 * 4
    action_size = 16
    hiddens = [128, 128]
    n_atoms = 1

    key = jax.random.PRNGKey(0)
    k_obs, k_act, k_par = jax.random.split(key, 3)
    observation = jax.random.normal(k_obs, (batch,) + state_shape, jnp.float32)
    action = jax.random.normal(k_act, (batch, action_size), jnp.float32)

    params = init_params(k_par, state_size, action_size, hiddens, n_atoms)
    packed = pack_params(params)

    out = critic_forward(observation, action, packed)
    out = jax.block_until_ready(out)

    ref = critic_reference(observation, action, params)
    assert out.shape == (batch, n_atoms), out.shape
    assert jnp.allclose(out, ref, atol=1e-4, rtol=1e-4), "Pallas kernel mismatch vs reference"

    print("KERNEL_OK")
</pallas_src>

<mosaic_0001>
module attributes {stable_mosaic.version = 11 : i64} {
  func.func @critic_kernel(%arg0: i32, %arg1: memref<8x80xbf16, #tpu.memory_space<vmem>>, %arg2: memref<64x128xbf16, #tpu.memory_space<vmem>>, %arg3: memref<144x128xbf16, #tpu.memory_space<vmem>>, %arg4: memref<2x128xf32, #tpu.memory_space<vmem>>, %arg5: memref<1x128xf32, #tpu.memory_space<vmem>>, %arg6: memref<1x1xf32, #tpu.memory_space<smem>>, %arg7: memref<8x1xf32, #tpu.memory_space<vmem>>) attributes {dimension_semantics = [#tpu.dimension_semantics<parallel>], iteration_bounds = array<i64: 1>, scalar_prefetch = 0 : i64, scratch_operands = 0 : i64, tpu.core_type = #tpu.core_type<tc>, window_params = [{transform_indices = @transform_0, window_bounds = array<i64: 8, 80>}, {pipeline_mode = #tpu.pipeline_mode<synchronous>, transform_indices = @transform_1, window_bounds = array<i64: 64, 128>}, {pipeline_mode = #tpu.pipeline_mode<synchronous>, transform_indices = @transform_2, window_bounds = array<i64: 144, 128>}, {pipeline_mode = #tpu.pipeline_mode<synchronous>, transform_indices = @transform_3, window_bounds = array<i64: 2, 128>}, {pipeline_mode = #tpu.pipeline_mode<synchronous>, transform_indices = @transform_4, window_bounds = array<i64: 1, 128>}, {transform_indices = @transform_5, window_bounds = array<i64: 1, 1>}, {transform_indices = @transform_6, window_bounds = array<i64: 8, 1>}]} {
    %c0 = arith.constant 0 : index
    %c0_0 = arith.constant 0 : index
    %0 = vector.load %arg1[%c0, %c0_0] : memref<8x80xbf16, #tpu.memory_space<vmem>>, vector<8x80xbf16>
    %1 = vector.extract_strided_slice %0 {offsets = [0, 0], sizes = [8, 64], strides = [1, 1]} : vector<8x80xbf16> to vector<8x64xbf16>
    %2 = vector.extract_strided_slice %0 {offsets = [0, 64], sizes = [8, 16], strides = [1, 1]} : vector<8x80xbf16> to vector<8x16xbf16>
    %c0_1 = arith.constant 0 : index
    %c0_2 = arith.constant 0 : index
    %3 = vector.load %arg3[%c0_1, %c0_2] : memref<144x128xbf16, #tpu.memory_space<vmem>>, vector<144x128xbf16>
    %c0_3 = arith.constant 0 : index
    %c0_4 = arith.constant 0 : index
    %4 = vector.load %arg4[%c0_3, %c0_4] : memref<2x128xf32, #tpu.memory_space<vmem>>, vector<2x128xf32>
    %c0_5 = arith.constant 0 : index
    %c0_6 = arith.constant 0 : index
    %5 = vector.load %arg2[%c0_5, %c0_6] : memref<64x128xbf16, #tpu.memory_space<vmem>>, vector<64x128xbf16>
    %cst = arith.constant dense<0.000000e+00> : vector<8x128xf32>
    %6 = tpu.matmul %1, %5, %cst {dimension_numbers = #tpu.dot_dimension_numbers<[1], [0], [0], [1], [0, 0, 1, 1], [], []>} : vector<8x64xbf16>, vector<64x128xbf16>, vector<8x128xf32> -> vector<8x128xf32>
    %7 = vector.extract_strided_slice %4 {offsets = [0, 0], sizes = [1, 128], strides = [1, 1]} : vector<2x128xf32> to vector<1x128xf32>
    %8 = vector.broadcast %7 : vector<1x128xf32> to vector<8x128xf32>
    %9 = arith.addf %6, %8 : vector<8x128xf32>
    %cst_7 = arith.constant 0.000000e+00 : f32
    %10 = vector.broadcast %cst_7 : f32 to vector<8x128xf32>
    %11 = arith.maximumf %9, %10 : vector<8x128xf32>
    %12 = arith.truncf %11 : vector<8x128xf32> to vector<8x128xbf16>
    %13 = vector.extract_strided_slice %3 {offsets = [0, 0], sizes = [128, 128], strides = [1, 1]} : vector<144x128xbf16> to vector<128x128xbf16>
    %cst_8 = arith.constant dense<0.000000e+00> : vector<8x128xf32>
    %14 = tpu.matmul %12, %13, %cst_8 {dimension_numbers = #tpu.dot_dimension_numbers<[1], [0], [0], [1], [0, 0, 1, 1], [], []>} : vector<8x128xbf16>, vector<128x128xbf16>, vector<8x128xf32> -> vector<8x128xf32>
    %15 = vector.extract_strided_slice %3 {offsets = [128, 0], sizes = [16, 128], strides = [1, 1]} : vector<144x128xbf16> to vector<16x128xbf16>
    %cst_9 = arith.constant dense<0.000000e+00> : vector<8x128xf32>
    %16 = tpu.matmul %2, %15, %cst_9 {dimension_numbers = #tpu.dot_dimension_numbers<[1], [0], [0], [1], [0, 0, 1, 1], [], []>} : vector<8x16xbf16>, vector<16x128xbf16>, vector<8x128xf32> -> vector<8x128xf32>
    %17 = arith.addf %14, %16 : vector<8x128xf32>
    %18 = vector.extract_strided_slice %4 {offsets = [1, 0], sizes = [1, 128], strides = [1, 1]} : vector<2x128xf32> to vector<1x128xf32>
    %19 = vector.broadcast %18 : vector<1x128xf32> to vector<8x128xf32>
    %20 = arith.addf %17, %19 : vector<8x128xf32>
    %cst_10 = arith.constant 0.000000e+00 : f32
    %21 = vector.broadcast %cst_10 : f32 to vector<8x128xf32>
    %22 = arith.maximumf %20, %21 : vector<8x128xf32>
    %c0_11 = arith.constant 0 : index
    %c0_12 = arith.constant 0 : index
    %23 = vector.load %arg5[%c0_11, %c0_12] : memref<1x128xf32, #tpu.memory_space<vmem>>, vector<1x128xf32>
    %24 = vector.broadcast %23 : vector<1x128xf32> to vector<8x128xf32>
    %25 = arith.mulf %22, %24 : vector<8x128xf32>
    %cst_13 = arith.constant dense<0.000000e+00> : vector<8xf32>
    %26 = vector.multi_reduction <add>, %25, %cst_13 [1] : vector<8x128xf32> to vector<8xf32>
    %27 = vector.shape_cast %26 : vector<8xf32> to vector<8x1xf32>
    %c0_14 = arith.constant 0 : index
    %c0_15 = arith.constant 0 : index
    %28 = memref.load %arg6[%c0_14, %c0_15] : memref<1x1xf32, #tpu.memory_space<smem>>
    %29 = vector.broadcast %28 : f32 to vector<8x1xf32>
    %30 = arith.addf %27, %29 : vector<8x1xf32>
    %c0_16 = arith.constant 0 : index
    %c0_17 = arith.constant 0 : index
    %31 = vector.load %arg7[%c0_16, %c0_17] : memref<8x1xf32, #tpu.memory_space<vmem>>, vector<8x1xf32>
    tpu.vector_store %arg7[%c0_16, %c0_17], %30 {strides = array<i32>} : memref<8x1xf32, #tpu.memory_space<vmem>>, vector<8x1xf32>,
    return
  }
  func.func @transform_0(%arg0: i32) -> (i32, i32) {
    %c0_i32 = arith.constant 0 : i32
    %c0_i32_0 = arith.constant 0 : i32
    return %arg0, %c0_i32 : i32, i32
  }
  func.func @transform_1(%arg0: i32) -> (i32, i32) {
    %c0_i32 = arith.constant 0 : i32
    %c0_i32_0 = arith.constant 0 : i32
    %c0_i32_1 = arith.constant 0 : i32
    return %c0_i32, %c0_i32_0 : i32, i32
  }
  func.func @transform_2(%arg0: i32) -> (i32, i32) {
    %c0_i32 = arith.constant 0 : i32
    %c0_i32_0 = arith.constant 0 : i32
    %c0_i32_1 = arith.constant 0 : i32
    return %c0_i32, %c0_i32_0 : i32, i32
  }
  func.func @transform_3(%arg0: i32) -> (i32, i32) {
    %c0_i32 = arith.constant 0 : i32
    %c0_i32_0 = arith.constant 0 : i32
    %c0_i32_1 = arith.constant 0 : i32
    return %c0_i32, %c0_i32_0 : i32, i32
  }
  func.func @transform_4(%arg0: i32) -> (i32, i32) {
    %c0_i32 = arith.constant 0 : i32
    %c0_i32_0 = arith.constant 0 : i32
    %c0_i32_1 = arith.constant 0 : i32
    return %c0_i32, %c0_i32_0 : i32, i32
  }
  func.func @transform_5(%arg0: i32) -> (i32, i32) {
    %c0_i32 = arith.constant 0 : i32
    %c0_i32_0 = arith.constant 0 : i32
    %c0_i32_1 = arith.constant 0 : i32
    return %c0_i32, %c0_i32_0 : i32, i32
  }
  func.func @transform_6(%arg0: i32) -> (i32, i32) {
    %c0_i32 = arith.constant 0 : i32
    %c0_i32_0 = arith.constant 0 : i32
    return %arg0, %c0_i32 : i32, i32
  }
}

</mosaic_0001>

<bundles_post_ra>
// kernel: critic_forward.1
= control target key start
LH: loop header
LB: loop body
LE: loop exit
PB: predicated region body
PF: predicated region fallthrough
CT: control target
= control target key end

     0   :  { %v383_v0 = vmov 0.0   ;;  %vm384_vm0 = vmmov 0   ;;  %s385_s7 = smov 64   ;;  %vm81_vm1 = vcmask 523264   ;;  %vm138_vm2 = vcmask 130048   ;;  %s478_s1 = inlined_call_operand.vmem [shape: bf16[64,128], index: 1, kind: input, shape index: {}]   ;;  %s479_s0 = inlined_call_operand.vmem [shape: bf16[8,80], index: 0, kind: input, shape index: {}]   ;;  %s480_s2 = inlined_call_operand.vmem [shape: bf16[144,128], index: 2, kind: input, shape index: {}]   ;;  %s481_s3 = inlined_call_operand.vmem [shape: f32[2,128], index: 3, kind: input, shape index: {}]   ;;  %s482_s4 = inlined_call_operand.vmem [shape: f32[1,128], index: 4, kind: input, shape index: {}]   ;;  %s483_s5 = inlined_call_operand.<no memory space> [shape: f32[1,1], index: 5, kind: input, shape index: {}]   ;;  %s484_s6 = inlined_call_operand.vmem [shape: f32[8,1], index: 6, kind: output, shape index: {}]  }
   0x1   :  { %328 = vmatprep.subr.bf16.mxu0 %v383_v0  ;;  %v369_v1 = vld [vmem:[%s478_s1] sm:$0xff]   ;;  %336 = vmatprep.mubr.msk.bf16.mxu0 %vm384_vm0, %v383_v0  ;;  %v370_v2 = vld [vmem:[%s478_s1 + $0x8] sm:$0xff]   ;;  %v371_v6 = vld [vmem:[%s478_s1 + $0x10] sm:$0xff]   ;;  %v53_v17 = vlaneseq  ;;  %v287_v44 = vstv %s483_s5  ;;  %vm289_vm3 = vcmask 7168  }
   0x2   :  { %346 = vmatprep.subr.bf16.mxu1 %v383_v0  ;;  %362 = vmatprep.mubr.msk.bf16.mxu1 %vm384_vm0, %v383_v0  ;;  %v25_v3 = vld [vmem:[%s479_s0] sm:$0xf]  ;;  %v375_v7 = vld [vmem:[%s480_s2 + $0x8] sm:$0xff]   ;;  %v372_v8 = vld [vmem:[%s478_s1 + $0x18] sm:$0xff]  }
   0x3   :  { %329 = vmatpush3.bf16.msra.mxu0 %v369_v1  ;;  %v300_v4 = vcombine.low %v25_v3, %v25_v3  ;;  %v374_v5 = vld [vmem:[%s480_s2] sm:$0xff]   ;;  %v376_v9 = vld [vmem:[%s480_s2 + $0x10] sm:$0xff]   ;;  %v377_v11 = vld [vmem:[%s480_s2 + $0x18] sm:$0xff]   ;;  %v54_v18 = vshrl.u32 %v53_v17, 7 }
   0x4   :  { %330 = vmatprep.subr.bf16.mxu0 %v383_v0  ;;  %347 = vmatpush3.bf16.msra.mxu1 %v374_v5  ;;  %v380_v10 = vld [vmem:[%s480_s2 + $0x40] sm:$0xff]   ;;  %v379_v13 = vld [vmem:[%s480_s2 + $0x28] sm:$0xff]   ;;  %v381_v14 = vld [vmem:[%s480_s2 + $0x30] sm:$0xff]  }
   0x5   :  { %130 = vrot.lane.b32.xlu0 %v300_v4, %s385_s7  ;;  %348 = vmatprep.subr.bf16.mxu1 %v383_v0  ;;  %v378_v12 = vld [vmem:[%s480_s2 + $0x20] sm:$0xff]   ;;  %v382_v15 = vld [vmem:[%s480_s2 + $0x38] sm:$0xff]   ;;  %v55_v19 = vsub.s32 0, %v54_v18  ;;  %v272_v33 = vsub.s32 1, %v54_v18 }
   0x6   :  { %v44_v20 = vld [vmem:[%s481_s3] sm:$0x3] }
   0x7   :  { %331 = vmatpush3.bf16.msra.mxu0 %v370_v2  ;;  %v56_v21 = vrot.slane %v44_v20, %v55_v19  ;;  %v273_v34 = vrot.slane %v44_v20, %v272_v33  ;;  %v311_v41 = vld [vmem:[%s482_s4] ss:$0 sm:$0xff] }
   0x8   :  { %332 = vmatprep.subr.bf16.mxu0 %v383_v0  ;;  %349 = vmatpush3.bf16.msra.mxu1 %v375_v7 }
   0x9   :  { %350 = vmatprep.subr.bf16.mxu1 %v383_v0 }
   0xb   :  { %333 = vmatpush3.bf16.msra.mxu0 %v371_v6 }
   0xc   :  { %334 = vmatprep.subr.bf16.mxu0 %v383_v0  ;;  %351 = vmatpush3.bf16.msra.mxu1 %v376_v9 }
   0xd   :  { %352 = vmatprep.subr.bf16.mxu1 %v383_v0 }
   0xf   :  { %335 = vmatpush3.bf16.msra.mxu0 %v372_v8 }
  0x10   :  { %340 = vmatprep.subr.bf16.mxu0 %v383_v0  ;;  %353 = vmatpush3.bf16.msra.mxu1 %v377_v11 }
  0x11   :  { %354 = vmatprep.subr.bf16.mxu1 %v383_v0 }
  0x12   :  { %337 = vmatmul.mubr.msk.bf16.vlgmr.msra.gmra.mrb[0].mxu0 %vm81_vm1, %v25_v3 }
  0x13   :  { %341 = vmatpush3.bf16.msra.mxu0 %v380_v10  ;;  %342 = vmatprep.mubr.msk.bf16.mxu0 %vm384_vm0, %v383_v0 }
  0x14   :  { %355 = vmatpush3.bf16.msra.mxu1 %v378_v12 }
  0x15   :  { %356 = vmatprep.subr.bf16.mxu1 %v383_v0 }
  0x18   :  { %357 = vmatpush3.bf16.msra.mxu1 %v379_v13 }
  0x19   :  { %358 = vmatprep.subr.bf16.mxu1 %v383_v0 }
  0x1c   :  { %359 = vmatpush3.bf16.msra.mxu1 %v381_v14 }
  0x1d   :  { %360 = vmatprep.subr.bf16.mxu1 %v383_v0 }
  0x20   :  { %361 = vmatpush3.bf16.msra.mxu1 %v382_v15 }
  0x77   :  { %v131_v16 = vpop.permute.xlu0 %130 }
  0x78   :  { %343 = vmatmul.mubr.msk.bf16.vlgmr.msra.gmra.mrb[4].mxu0 %vm138_vm2, %v131_v16 }
  0xe5   :  { %v119_v22 = vpop.f32.mrb[0].mxu0 }
  0xe6   :  { %v120_v23 = vadd.f32 %v119_v22, %v56_v21  ;;  %v338_v24 = vpop.f32.mrb[1].mxu0 }
  0xe7   :  { %v122_v25 = vpop.f32.mrb[2].mxu0 }
  0xe8   :  { %v125_v26 = vmax.f32 %v120_v23, 0.0  ;;  %v339_v27 = vpop.f32.mrb[3].mxu0 }
  0xea   :  { %v126_v28 = vpack.c.bf16 %v125_v26, %v125_v26 }
  0xec   :  { %363 = vmatmul.mubr.bf16.vlgmr.msra.gmra.mrb[0].mxu1 %v126_v28 }
 0x14b   :  { %v176_v29 = vpop.f32.mrb[4].mxu0 }
 0x14c   :  { %v344_v30 = vpop.f32.mrb[5].mxu0 }
 0x14d   :  { %v179_v31 = vpop.f32.mrb[6].mxu0 }
 0x14e   :  { %v345_v32 = vpop.f32.mrb[7].mxu0 }
 0x1bf   :  { %v264_v35 = vpop.f32.mrb[0].mxu1 }
 0x1c0   :  { %v265_v36 = vadd.f32 %v264_v35, %v176_v29  ;;  %v364_v37 = vpop.f32.mrb[1].mxu1 }
 0x1c1   :  { %v267_v38 = vpop.f32.mrb[2].mxu1 }
 0x1c2   :  { %v274_v39 = vadd.f32 %v273_v34, %v265_v36  ;;  %v365_v40 = vpop.f32.mrb[3].mxu1 }
 0x1c4   :  { %v275_v42 = vmax.f32 %v274_v39, 0.0 }
 0x1c6   :  { %v283_v43 = vmul.f32 %v311_v41, %v275_v42 }
 0x1c8   :  { %284 = vadd.xlane.f32.xlu0 %v283_v43 }
 0x255   :  { %v285_v45 = vpop.xlane.xlu0 %284 }
 0x256   :  { %v288_v46 = vadd.f32 %v287_v44, %v285_v45 }
 0x258   :  { %290 = vst.msk [vmem:[%s484_s6] sm:$0xff] %vm289_vm3, %v288_v46 }

</bundles_post_ra>
